<compile_context>
chip_gen: v5e
topology: v5e:2x2
jax: 0.10.0
libtpu: 0.0.40
codegen_flags: <defaults>
</compile_context>

<pallas_src>
import jax
import jax.numpy as jnp
import numpy as np
from jax.experimental import pallas as pl
from jax.experimental.pallas import tpu as pltpu


def attention_kernel(x_ref, w_ref, len_ref, rep_ref, attn_ref):
    # x arrives in its storage dtype (f32 or bf16); all math accumulates in f32.
    x = x_ref[...].astype(jnp.float32)                     # (tb, L, H)
    w = w_ref[...]                                         # (1, H) f32
    lengths = len_ref[...]                                 # (tb, 1) int32
    tb, l, h = x.shape

    # scores[b, l] = sum_h x[b, l, h] * w[h]
    # VPU broadcast-multiply + lane (XLU) reduction; avoids per-batch M=1 MXU
    # matmuls and the (L, H)->(H, L) transpose a dot_general over h would need.
    scores = jnp.sum(x * w, axis=-1)                       # (tb, L) f32

    # relu + length-masked softmax fused into a single normalization.
    # softmax-then-mask-renormalize == (exp after max-shift) * mask / masked-sum,
    # so taking the max over ALL L positions (including ones beyond `lengths`)
    # is algebraically identical to the PyTorch reference -- do not "fix" this
    # to a masked max, that would change semantics.
    s = jnp.maximum(scores, 0.0)
    idx = jax.lax.broadcasted_iota(jnp.int32, (1, l), 1)   # (1, L)
    mask = (idx < lengths).astype(jnp.float32)             # (tb, L)
    m = jnp.max(s, axis=-1, keepdims=True)                 # (tb, 1)
    e = jnp.exp(s - m) * mask                              # (tb, L)
    denom = jnp.sum(e, axis=-1, keepdims=True)             # (tb, 1)
    # NOTE: rows with lengths == 0 produce NaN (0/0), matching the PyTorch reference.
    att = e * pl.reciprocal(denom, approx=False)           # (tb, L)
    attn_ref[...] = att

    # rep[b, h] = sum_l att[b, l] * x[b, l, h]
    # VPU multiply + sublane reduction; everything is row-local, so any garbage
    # rows in a ragged last batch tile cannot contaminate valid rows.
    rep_ref[...] = jnp.sum(x * att[:, :, None], axis=1)    # (tb, H)


def _round_up(v, m):
    return (v + m - 1) // m * m


def _choose_batch_tile(B, L, H, x_itemsize):
    """Generation-aware batch-tile size and VMEM limit."""
    try:
        phys_vmem = int(pltpu.get_tpu_info().vmem_capacity_bytes)
        if phys_vmem <= 0:
            raise ValueError
    except Exception:
        phys_vmem = 64 << 20                      # conservative: v7x per-TC size
    # ~48 MiB budget on 128 MiB parts (v5e/v6e), ~24 MiB on v7x (64 MiB per TC).
    budget = phys_vmem * 3 // 8

    # Per-batch-row VMEM footprint of the pipeline:
    #   double-buffered x DMA tile, the f32 working copy / weighted product of x,
    #   and the (L)/(H)-sized f32 row temporaries plus both double-buffered
    #   output blocks.
    bytes_per_row = (2 * L * H * x_itemsize
                     + 2 * L * H * 4
                     + 16 * (L + H) * 4)
    max_tb = max(8, (budget // max(bytes_per_row, 1)) // 8 * 8)

    if B <= 8:
        tb = B                                    # single tile; block dim == full dim
    else:
        # At least 2 grid tiles so megacore parts (v7x) can shard the batch across
        # both TensorCores, but never below 8 rows (sublane granularity) and never
        # above the VMEM cap.
        tb = min(max_tb, max(8, _round_up(pl.cdiv(B, 2), 8)))

    # vmem_limit derived from the same accounting, with ~30% headroom.
    needed = tb * bytes_per_row + 4 * H * 4 + (1 << 20)
    vmem_limit = int(min(max(needed * 13 // 10, 32 << 20), phys_vmem * 3 // 4))
    return tb, vmem_limit


def attention_forward(x, lengths, att_weights):
    """Batch-first attention pooling.

    x: (B, L, H) f32 or bf16; lengths: (B,) int; att_weights: (1, H).
    Returns (representations (B, H) f32, attentions (B, L) f32).
    """
    x = jnp.asarray(x)
    if x.dtype not in (jnp.float32, jnp.bfloat16):
        x = x.astype(jnp.float32)
    B, L, H = x.shape
    w = jnp.asarray(att_weights, jnp.float32).reshape(1, H)
    lengths2 = jnp.asarray(lengths, jnp.int32).reshape(B, 1)

    tb, vmem_limit = _choose_batch_tile(B, L, H, x.dtype.itemsize)
    grid = (pl.cdiv(B, tb),)   # ragged tail handled by Pallas' masked writeback; no jnp.pad copy

    flops = 4 * B * L * H + 8 * B * L
    bytes_accessed = (B * L * H * x.dtype.itemsize
                      + 4 * (B * L + B * H + B + H))

    rep, attn = pl.pallas_call(
        attention_kernel,
        out_shape=(
            jax.ShapeDtypeStruct((B, H), jnp.float32),
            jax.ShapeDtypeStruct((B, L), jnp.float32),
        ),
        grid=grid,
        in_specs=[
            pl.BlockSpec((tb, L, H), lambda i: (i, 0, 0)),   # x, streamed per batch tile
            pl.BlockSpec((1, H), lambda i: (0, 0)),          # att_weights, resident
            pl.BlockSpec((tb, 1), lambda i: (i, 0)),         # lengths per batch tile
        ],
        out_specs=(
            pl.BlockSpec((tb, H), lambda i: (i, 0)),         # representations
            pl.BlockSpec((tb, L), lambda i: (i, 0)),         # attentions
        ),
        # Batch tiles are independent -> shard across TensorCores on megacore parts.
        compiler_params=pltpu.CompilerParams(
            dimension_semantics=("parallel",),
            vmem_limit_bytes=vmem_limit),
        # Memory-bound custom call; give XLA a scheduling hint.
        cost_estimate=pl.CostEstimate(
            flops=int(flops),
            transcendentals=int(B * L),
            bytes_accessed=int(bytes_accessed)),
    )(x, w, lengths2)
    return rep, attn


def attention_reference(x, lengths, att_weights):
    # Pure-JAX reference mirroring the PyTorch forward.
    B, L, H = x.shape
    xf = x.astype(jnp.float32)
    scores = jnp.einsum("blh,oh->bl", xf, jnp.asarray(att_weights, jnp.float32))
    p = jax.nn.softmax(jax.nn.relu(scores), axis=-1)
    mask = (jnp.arange(L)[None, :] < lengths[:, None]).astype(jnp.float32)
    masked = p * mask
    att = masked / jnp.sum(masked, axis=-1, keepdims=True)
    rep = jnp.sum(xf * att[:, :, None], axis=1)
    return rep, att


if __name__ == "__main__":
    L, H = 8, 32  # seq len, hidden_size

    key = jax.random.PRNGKey(0)
    kx, kw, kx2, kl2 = jax.random.split(key, 4)

    # Deterministic parameter init: uniform(-stdv, stdv), stdv = 1/sqrt(hidden)
    stdv = 1.0 / np.sqrt(H)
    att_weights = jax.random.uniform(kw, (1, H), jnp.float32, -stdv, stdv)

    # Small, module-consistent case: batch=2, seq=8, hidden=32.
    x = jax.random.normal(kx, (2, L, H), jnp.float32)
    lengths = jnp.array([5, 8], dtype=jnp.int32)   # one short sequence, one full
    rep, attn = attention_forward(x, lengths, att_weights)
    jax.block_until_ready((rep, attn))
    rep_ref, attn_ref = attention_reference(x, lengths, att_weights)
    # VPU f32 accumulation everywhere -> tight tolerance (would catch real regressions).
    np.testing.assert_allclose(np.asarray(rep), np.asarray(rep_ref), rtol=1e-5, atol=1e-5)
    np.testing.assert_allclose(np.asarray(attn), np.asarray(attn_ref), rtol=1e-5, atol=1e-5)

    # Multi-tile + ragged-tail case (grid > 1, last batch tile only partially valid).
    B2 = 24
    x2 = jax.random.normal(kx2, (B2, L, H), jnp.float32)
    lengths2 = jax.random.randint(kl2, (B2,), 1, L + 1, dtype=jnp.int32)
    rep2, attn2 = attention_forward(x2, lengths2, att_weights)
    jax.block_until_ready((rep2, attn2))
    rep2_ref, attn2_ref = attention_reference(x2, lengths2, att_weights)
    np.testing.assert_allclose(np.asarray(rep2), np.asarray(rep2_ref), rtol=1e-5, atol=1e-5)
    np.testing.assert_allclose(np.asarray(attn2), np.asarray(attn2_ref), rtol=1e-5, atol=1e-5)

    print("KERNEL_OK")
</pallas_src>

<mosaic_0001>
module attributes {stable_mosaic.version = 11 : i64} {
  func.func @attention_kernel(%arg0: i32, %arg1: memref<2x8x32xf32, #tpu.memory_space<vmem>>, %arg2: memref<1x32xf32, #tpu.memory_space<vmem>>, %arg3: memref<2x1xi32, #tpu.memory_space<vmem>>, %arg4: memref<2x32xf32, #tpu.memory_space<vmem>>, %arg5: memref<2x8xf32, #tpu.memory_space<vmem>>) attributes {dimension_semantics = [#tpu.dimension_semantics<parallel>], iteration_bounds = array<i64: 1>, scalar_prefetch = 0 : i64, scratch_operands = 0 : i64, tpu.core_type = #tpu.core_type<tc>, window_params = [{transform_indices = @transform_0, window_bounds = array<i64: 2, 8, 32>}, {pipeline_mode = #tpu.pipeline_mode<synchronous>, transform_indices = @transform_1, window_bounds = array<i64: 1, 32>}, {transform_indices = @transform_2, window_bounds = array<i64: 2, 1>}, {transform_indices = @transform_3, window_bounds = array<i64: 2, 32>}, {transform_indices = @transform_4, window_bounds = array<i64: 2, 8>}]} {
    %c0 = arith.constant 0 : index
    %c0_0 = arith.constant 0 : index
    %c0_1 = arith.constant 0 : index
    %0 = vector.load %arg1[%c0, %c0_0, %c0_1] : memref<2x8x32xf32, #tpu.memory_space<vmem>>, vector<2x8x32xf32>
    %c0_2 = arith.constant 0 : index
    %c0_3 = arith.constant 0 : index
    %1 = vector.load %arg2[%c0_2, %c0_3] : memref<1x32xf32, #tpu.memory_space<vmem>>, vector<1x32xf32>
    %c0_4 = arith.constant 0 : index
    %c0_5 = arith.constant 0 : index
    %2 = vector.load %arg3[%c0_4, %c0_5] : memref<2x1xi32, #tpu.memory_space<vmem>>, vector<2x1xi32>
    %3 = vector.shape_cast %1 : vector<1x32xf32> to vector<1x1x32xf32>
    %4 = vector.broadcast %3 : vector<1x1x32xf32> to vector<2x8x32xf32>
    %5 = arith.mulf %0, %4 : vector<2x8x32xf32>
    %cst = arith.constant dense<0.000000e+00> : vector<2x8xf32>
    %6 = vector.multi_reduction <add>, %5, %cst [2] : vector<2x8x32xf32> to vector<2x8xf32>
    %cst_6 = arith.constant 0.000000e+00 : f32
    %7 = vector.broadcast %cst_6 : f32 to vector<2x8xf32>
    %8 = arith.maximumf %6, %7 : vector<2x8xf32>
    %9 = tpu.iota {dimensions = array<i32: 1>} : vector<1x8xi32>
    %10 = vector.broadcast %9 : vector<1x8xi32> to vector<2x8xi32>
    %11 = vector.broadcast %2 : vector<2x1xi32> to vector<2x8xi32>
    %12 = arith.cmpi slt, %10, %11 : vector<2x8xi32>
    %13 = arith.extui %12 : vector<2x8xi1> to vector<2x8xi32>
    %14 = arith.sitofp %13 : vector<2x8xi32> to vector<2x8xf32>
    %cst_7 = arith.constant dense<0xFF800000> : vector<2xf32>
    %15 = vector.multi_reduction <maximumf>, %8, %cst_7 [1] : vector<2x8xf32> to vector<2xf32>
    %16 = vector.shape_cast %15 : vector<2xf32> to vector<2x1xf32>
    %17 = vector.broadcast %16 : vector<2x1xf32> to vector<2x8xf32>
    %18 = arith.subf %8, %17 : vector<2x8xf32>
    %19 = math.exp %18 : vector<2x8xf32>
    %20 = arith.mulf %19, %14 : vector<2x8xf32>
    %cst_8 = arith.constant dense<0.000000e+00> : vector<2xf32>
    %21 = vector.multi_reduction <add>, %20, %cst_8 [1] : vector<2x8xf32> to vector<2xf32>
    %22 = vector.shape_cast %21 : vector<2xf32> to vector<2x1xf32>
    %23 = tpu.reciprocal %22 : vector<2x1xf32> -> vector<2x1xf32>
    %24 = vector.broadcast %23 : vector<2x1xf32> to vector<2x8xf32>
    %25 = arith.mulf %20, %24 : vector<2x8xf32>
    %c0_9 = arith.constant 0 : index
    %c0_10 = arith.constant 0 : index
    %26 = vector.load %arg5[%c0_9, %c0_10] : memref<2x8xf32, #tpu.memory_space<vmem>>, vector<2x8xf32>
    tpu.vector_store %arg5[%c0_9, %c0_10], %25 {strides = array<i32>} : memref<2x8xf32, #tpu.memory_space<vmem>>, vector<2x8xf32>,
    %27 = vector.shape_cast %25 : vector<2x8xf32> to vector<2x8x1xf32>
    %28 = vector.broadcast %27 : vector<2x8x1xf32> to vector<2x8x32xf32>
    %29 = arith.mulf %0, %28 : vector<2x8x32xf32>
    %cst_11 = arith.constant dense<0.000000e+00> : vector<2x32xf32>
    %30 = vector.multi_reduction <add>, %29, %cst_11 [1] : vector<2x8x32xf32> to vector<2x32xf32>
    %c0_12 = arith.constant 0 : index
    %c0_13 = arith.constant 0 : index
    %31 = vector.load %arg4[%c0_12, %c0_13] : memref<2x32xf32, #tpu.memory_space<vmem>>, vector<2x32xf32>
    tpu.vector_store %arg4[%c0_12, %c0_13], %30 {strides = array<i32>} : memref<2x32xf32, #tpu.memory_space<vmem>>, vector<2x32xf32>,
    return
  }
  func.func @transform_0(%arg0: i32) -> (i32, i32, i32) {
    %c0_i32 = arith.constant 0 : i32
    %c0_i32_0 = arith.constant 0 : i32
    %c0_i32_1 = arith.constant 0 : i32
    return %arg0, %c0_i32, %c0_i32_0 : i32, i32, i32
  }
  func.func @transform_1(%arg0: i32) -> (i32, i32) {
    %c0_i32 = arith.constant 0 : i32
    %c0_i32_0 = arith.constant 0 : i32
    %c0_i32_1 = arith.constant 0 : i32
    return %c0_i32, %c0_i32_0 : i32, i32
  }
  func.func @transform_2(%arg0: i32) -> (i32, i32) {
    %c0_i32 = arith.constant 0 : i32
    %c0_i32_0 = arith.constant 0 : i32
    return %arg0, %c0_i32 : i32, i32
  }
  func.func @transform_3(%arg0: i32) -> (i32, i32) {
    %c0_i32 = arith.constant 0 : i32
    %c0_i32_0 = arith.constant 0 : i32
    return %arg0, %c0_i32 : i32, i32
  }
  func.func @transform_4(%arg0: i32) -> (i32, i32) {
    %c0_i32 = arith.constant 0 : i32
    %c0_i32_0 = arith.constant 0 : i32
    return %arg0, %c0_i32 : i32, i32
  }
}

</mosaic_0001>

<bundles_post_ra>
// kernel: tpu_custom_call.1
= control target key start
LH: loop header
LB: loop body
LE: loop exit
PB: predicated region body
PF: predicated region fallthrough
CT: control target
= control target key end

     0   :  { %10 = vsyncpa [#allocation3], 0  ;;  %s384_s0 = inlined_call_operand.hbm [shape: f32[2,8,32], index: 0, kind: input, shape index: {}]   ;;  %s385_s1 = inlined_call_operand.vmem [shape: f32[1,32], index: 1, kind: input, shape index: {}]   ;;  %s386_s2 = inlined_call_operand.vmem [shape: s32[2,1], index: 2, kind: input, shape index: {}]   ;;  %s387_s3 = inlined_call_operand.hbm [shape: f32[2,32], index: 3, kind: output, shape index: {0}]   ;;  %s388_s4 = inlined_call_operand.hbm [shape: f32[2,8], index: 4, kind: output, shape index: {1}]  }
   0x1   :  { %11 = vsyncpa [#allocation4], 0 }
   0x2   :  { %12 = vsyncpa [#allocation7], 0  ;;  %s17_s17 = sshll.u32 %s384_s0, 4  ;;  %s309_s18 = smov [#allocation2]   ;;  %s18_s17 = int_to_ptr.hbm [resolvable:$true] %s17_s17 }
   0x3   :  { %s19_s19 = sshll.u32 %s309_s18, 4  ;;  %s310_s20 = smov 128   ;;  %s20_s19 = int_to_ptr.vmem [resolvable:$true] %s19_s19 }
   0x4   :  { %s311_s21 = smov 8  }
   0x5   :  { %25 = dma.hbm_to_vmem [thread:$0]  %s18_s17, 256, %s20_s19, [#allocation3], %s310_s20, %s310_s20, %s311_s21  }
   0x6   :  { %303 = dma.done.wait [#allocation3], 256  }
   0x7   :  { %304 = vsyncadd [#allocation3], 4294967040  ;;  %v312_v0 = vmov 0   ;;  %v344_v1 = vld [vmem:[#allocation2] sm:$0xff]  ;;  %vm43_vm0 = vcmask 261120   ;;  %v353_v5 = vld [vmem:[#allocation2 + $0x8] sm:$0xff]  ;;  %v52_v9 = vlaneseq }
   0x8   :  { %215 = vset.pattern.permute.xlu1 %v312_v0  ;;  %223 = vset.pattern.permute.xlu0 %v312_v0  ;;  %v224_v2 = vld [vmem:[%s385_s1] ss:$0 sm:$0xff]  ;;  %v313_v13 = vmov 0.0   ;;  %vm64_vm2 = vcmask 1041409   ;;  %vm67_vm3 = vcmask 58368   ;;  %s314_s1 = smov [#allocation6]  }
   0x9   :  { %v37_v3 = vld [vmem:[%s386_s2] sm:$0x3]  ;;  %v41_v4 = vmul.f32 %v224_v2, %v344_v1  ;;  %v42_v7 = vmul.f32 %v224_v2, %v353_v5  ;;  %v85_v10 = vshrl.u32 %v52_v9, 7  ;;  %v358_v11 = vand.u32 127, %v52_v9  ;;  %s190_s2 = sshll.u32 %s314_s1, 4  ;;  %s192_s27 = sshll.u32 %s388_s4, 4  ;;  %s191_s2 = int_to_ptr.vmem [resolvable:$true] %s190_s2  ;;  %s193_s27 = int_to_ptr.hbm [resolvable:$true] %s192_s27 }
   0xa   :  { %55 = vperm.xlu1 %215, %v37_v3   ;;  %s315_s4 = smov [#allocation5]   ;;  %s181_s5 = sshll.u32 %s387_s3, 4  ;;  %vm172_vm8 = vcmask 254976   ;;  %s182_s5 = int_to_ptr.hbm [resolvable:$true] %s181_s5 }
   0xb   :  { %v44_v6 = vsel %vm43_vm0, %v41_v4, 0.0  ;;  %v47_v8 = vsel %vm43_vm0, %v42_v7, 0.0  ;;  %216 = vset.pattern.permute.xlu2 %v85_v10  ;;  %s179_s28 = sshll.u32 %s315_s4, 4  ;;  %s180_s28 = int_to_ptr.vmem [resolvable:$true] %s179_s28 }
   0xc   :  { %45 = vadd.xlane.f32.xlu0 %v44_v6 }
  0x14   :  { %48 = vadd.xlane.f32.xlu0 %v47_v8 }
  0x7c   :  { %v56_v12 = vpop.permute.xlu1 %55 }
  0x7d   :  { %vm57_vm1 = vcmp.lt.s32.totalorder %v358_v11, %v56_v12 }
  0x7e   :  { %v207_v14 = vsel %vm57_vm1, 1.0, %v313_v13 }
  0x7f   :  { %v83_v15 = vperm.slane %v207_v14, 0  ;;  %v90_v16 = vperm.slane %v207_v14, 1  ;;  %v46_v17 = vpop.xlane.xlu0 %45 }
  0x80   :  { %v50_v19 = vmax.f32 %v46_v17, 0.0 }
  0x81   :  { %v217_v18 = vpack.i.bf16 %v90_v16, %v83_v15 }
  0x82   :  { %v62_v22 = vperm.slane %v50_v19, %v358_v11 }
  0x83   :  { %218 = vperm.xlu2 %216, %v217_v18  }
  0x87   :  { %v49_v20 = vpop.xlane.xlu0 %48 }
  0x88   :  { %v51_v21 = vmax.f32 %v49_v20, 0.0 }
  0x8a   :  { %v63_v23 = vperm.slane %v51_v21, %v358_v11 }
  0x8b   :  { %222 = vset.pattern.permute.xlu2 %v312_v0 }
  0x8c   :  { %v65_v24 = vsel %vm64_vm2, %v63_v23, %v62_v22 }
  0x8d   :  { %v68_v25 = vsel %vm67_vm3, %v65_v24, -inf }
  0x8e   :  { %69 = vmax.xlane.f32.xlu1 %v68_v25 }
  0xdd   :  { %v219_v33 = vpop.permute.xlu2 %218 }
  0xde   :  { %v220_v34 = vunpack.i.l.bf16 %v219_v33  ;;  %v221_v35 = vunpack.i.h.bf16 %v219_v33 }
 0x101   :  { %v70_v26 = vpop.xlane.xlu1 %69 }
 0x102   :  { %v72_v27 = vperm.slane %v70_v26, 0  ;;  %v73_v28 = vperm.slane %v70_v26, 1 }
 0x104   :  { %v76_v29 = vsub.f32 %v50_v19, %v72_v27  ;;  %v77_v30 = vsub.f32 %v51_v21, %v73_v28 }
 0x106   :  { %v78_v31 = vmul.f32 1.442695, %v76_v29  ;;  %v80_v32 = vmul.f32 1.442695, %v77_v30 }
 0x108   :  { %225 = vpow2.f32 %v78_v31 }
 0x109   :  { %227 = vpow2.f32 %v80_v32 }
 0x10e   :  { %v226_v36 = vpop.eup %225 }
 0x10f   :  { %v228_v37 = vpop.eup %227  ;;  %v99_v38 = vmul.f32 %v226_v36, %v220_v34 }
 0x110   :  { %v100_v39 = vmul.f32 %v228_v37, %v221_v35 }
 0x111   :  { %104 = vperm.xlu2 %222, %v99_v38  }
 0x112   :  { %107 = vperm.xlu0 %223, %v100_v39  }
 0x16b   :  { %v105_v40 = vpop.permute.xlu2 %104 }
 0x16c   :  { %v109_v42 = vperm.slane %v105_v40, %v358_v11 }
 0x184   :  { %v108_v41 = vpop.permute.xlu0 %107 }
 0x185   :  { %v110_v43 = vperm.slane %v108_v41, %v358_v11 }
 0x187   :  { %v111_v44 = vsel %vm64_vm2, %v110_v43, %v109_v42 }
 0x188   :  { %v113_v45 = vsel %vm67_vm3, %v111_v44, 0.0 }
 0x189   :  { %114 = vadd.xlane.f32.xlu2 %v113_v45 }
 0x1fc   :  { %v115_v46 = vpop.xlane.xlu2 %114 }
 0x1fd   :  { %229 = vrcp.f32 %v115_v46  ;;  %v127_v50 = vand.u32 2147483648, %v115_v46  ;;  %v125_v52 = vand.u32 2147483647, %v115_v46  ;;  %vm121_vm5 = vweird.f32 %v115_v46 }
 0x1ff   :  { %v128_v54 = vor.u32 1.1754944e-38, %v127_v50  ;;  %vm126_vm7 = vcmp.eq.f32.partialorder %v125_v52, 8.507059e+37 }
 0x203   :  { %v230_v47 = vpop.eup %229 }
 0x204   :  { %v117_v48 = vmul.f32 %v230_v47, %v115_v46  ;;  %vm122_vm4 = vweird.f32 %v230_v47 }
 0x205   :  { %vm123_vm6 = vmor %vm121_vm5, %vm122_vm4 }
 0x206   :  { %v118_v49 = vsub.f32 1.0, %v117_v48 }
 0x208   :  { %v119_v51 = vmul.f32 %v230_v47, %v118_v49 }
 0x20a   :  { %v120_v53 = vadd.f32 %v230_v47, %v119_v51 }
 0x20c   :  { %v124_v55 = vsel %vm123_vm6, %v230_v47, %v120_v53 }
 0x20d   :  { %v129_v56 = vsel %vm126_vm7, %v128_v54, %v124_v55 }
 0x20e   :  { %v132_v57 = vperm.slane %v129_v56, 1  ;;  %v131_v58 = vperm.slane %v129_v56, 0 }
 0x210   :  { %v136_v59 = vmul.f32 %v132_v57, %v100_v39  ;;  %v135_v60 = vmul.f32 %v131_v58, %v99_v38 }
 0x212   :  { %143 = vperm.xlu0 %223, %v136_v59   ;;  %140 = vperm.xlu1 %215, %v135_v60  }
 0x284   :  { %v144_v61 = vpop.permute.xlu0 %143  ;;  %v141_v62 = vpop.permute.xlu1 %140 }
 0x285   :  { %v146_v63 = vperm.slane %v144_v61, %v358_v11  ;;  %v153_v0 = vmul.f32 %v144_v61, %v353_v5  ;;  %v145_v2 = vperm.slane %v141_v62, %v358_v11  ;;  %v152_v3 = vmul.f32 %v141_v62, %v344_v1 }
 0x287   :  { %v161_v4 = vsel %vm43_vm0, %v153_v0, 0.0  ;;  %v147_v6 = vsel %vm64_vm2, %v146_v63, %v145_v2  ;;  %v154_v7 = vsel %vm43_vm0, %v152_v3, 0.0 }
 0x288   :  { %v162_v8 = vrot.slane %v161_v4, 4  ;;  %v155_v9 = vrot.slane %v154_v7, 4  ;;  %149 = vst.msk [vmem:[#allocation6] sm:$0x3] %vm67_vm3, %v147_v6 }
 0x289   :  { %195 = dma.vmem_to_hbm [thread:$0]  %s191_s2, 32, %s193_s27, [#allocation7]  }
 0x28a   :  { %v163_v10 = vadd.f32 %v162_v8, %v161_v4  ;;  %v156_v12 = vadd.f32 %v155_v9, %v154_v7 }
 0x28c   :  { %v164_v5 = vrot.slane %v163_v10, 2  ;;  %v157_v13 = vrot.slane %v156_v12, 2 }
 0x28e   :  { %v165_v11 = vadd.f32 %v164_v5, %v163_v10  ;;  %v158_v14 = vadd.f32 %v157_v13, %v156_v12 }
 0x290   :  { %v166_v1 = vrot.slane %v165_v11, 1  ;;  %v159_v15 = vrot.slane %v158_v14, 1 }
 0x292   :  { %v167_v16 = vadd.f32 %v166_v1, %v165_v11  ;;  %v160_v17 = vadd.f32 %v159_v15, %v158_v14 }
 0x294   :  { %v170_v18 = vsel %vm64_vm2, %v167_v16, %v160_v17 }
 0x295   :  { %173 = vst.msk [vmem:[#allocation5] sm:$0x3] %vm172_vm8, %v170_v18 }
 0x296   :  { %184 = dma.vmem_to_hbm [thread:$0]  %s180_s28, 32, %s182_s5, [#allocation4]  }
 0x297   :  { %305 = dma.done.wait [#allocation4], 32  }
 0x298   :  { %306 = vsyncadd [#allocation4], 4294967264 }
 0x299   :  { %307 = dma.done.wait [#allocation7], 32  }
 0x29a   :  { %308 = vsyncadd [#allocation7], 4294967264 }
 0x29b   :  { %204 = vsyncpa [#allocation3], 1 }
 0x29c   :  { %205 = vsyncpa [#allocation4], 1 }
 0x29d   :  { %206 = vsyncpa [#allocation7], 1 }

</bundles_post_ra>
